<compile_context>
chip_gen: v5e
topology: v5e:2x2
jax: 0.10.0
libtpu: 0.0.40
codegen_flags: <defaults>
</compile_context>

<pallas_src>
import jax
import jax.numpy as jnp
from jax.experimental import pallas as pl
from jax.experimental.pallas import tpu as pltpu

_LANE = 128                        # lane-dense last dim (full vreg lanes)
_MAX_BLOCK_BYTES = 4 * 1024 * 1024  # ~4 MiB per block buffer


def _warp_kernel(scale_ref, x_ref, o_ref):
    # Pure VPU elementwise: scale in f32 then cast back to the output dtype
    # (exact for f32 inputs; slightly more accurate for bf16 inputs).
    s = scale_ref[0]
    o_ref[...] = (x_ref[...].astype(jnp.float32) * s).astype(o_ref.dtype)


def uniform_box_warp(coordinates: jax.Array, sidelength) -> jax.Array:
    """coordinates: any-shape array -> same shape, scaled by 2/sidelength."""
    # Match torch promotion (int tensor * python float -> float32).
    if not jnp.issubdtype(coordinates.dtype, jnp.floating):
        coordinates = coordinates.astype(jnp.float32)
    dtype = coordinates.dtype
    orig_shape = coordinates.shape

    scale = jnp.asarray([2.0 / sidelength], dtype=jnp.float32)  # (1,) SMEM scalar

    flat = coordinates.reshape(-1)   # free (bitcast) for a contiguous input
    total = flat.shape[0]
    if total == 0:
        return coordinates

    pad = (-total) % _LANE
    if pad:
        # Rare fallback (total not a multiple of 128).
        # TODO(synk): handle this ragged tail with a masked 1D block instead
        # of a pad+slice round-trip through HBM.
        flat = jnp.pad(flat, (0, pad))
    rows = flat.shape[0] // _LANE
    x2d = flat.reshape(rows, _LANE)

    # Row tile: ~4 MiB per buffer, multiple of 8 (sublane constraint).  If the
    # whole array fits in one block, use the full extent (always a legal
    # block shape); otherwise the last block may be partial and Pallas masks it.
    max_tile_rows = max(8, (_MAX_BLOCK_BYTES // (_LANE * x2d.dtype.itemsize)) // 8 * 8)
    if rows <= max_tile_rows:
        tile_rows = rows
    else:
        tile_rows = max_tile_rows
    grid = (pl.cdiv(rows, tile_rows),)

    out2d = pl.pallas_call(
        _warp_kernel,
        out_shape=jax.ShapeDtypeStruct((rows, _LANE), dtype),
        grid=grid,
        in_specs=[
            pl.BlockSpec(memory_space=pltpu.MemorySpace.SMEM),      # scale (1,)
            pl.BlockSpec((tile_rows, _LANE), lambda i: (i, 0)),      # coords tile
        ],
        out_specs=pl.BlockSpec((tile_rows, _LANE), lambda i: (i, 0)),
        compiler_params=pltpu.CompilerParams(
            dimension_semantics=("parallel",),   # megacore split on v7x
            vmem_limit_bytes=32 * 1024 * 1024,   # headroom for 4x ~4 MiB buffers
        ),
    )(scale, x2d)

    out_flat = out2d.reshape(-1)
    if pad:
        out_flat = out_flat[:total]
    return out_flat.reshape(orig_shape)


if __name__ == "__main__":
    key = jax.random.PRNGKey(0)
    sidelength = 0.24  # scale_factor = 2 / 0.24

    # Primary test: B=2, N=64, C=3 -> 384 elements (multiple of 128, no pad path).
    B, N, C = 2, 64, 3
    coords = jax.random.uniform(key, (B, N, C), dtype=jnp.float32,
                                minval=-0.12, maxval=0.12)
    out = jax.block_until_ready(uniform_box_warp(coords, sidelength))
    ref = coords * (2.0 / sidelength)
    assert out.shape == coords.shape and out.dtype == coords.dtype
    assert jnp.allclose(out, ref, rtol=1e-6, atol=1e-6)

    # Secondary test: ragged total (5*7*3 = 105 elements) exercises the fallback.
    coords2 = jax.random.uniform(jax.random.PRNGKey(1), (5, 7, 3),
                                 dtype=jnp.float32, minval=-0.12, maxval=0.12)
    out2 = jax.block_until_ready(uniform_box_warp(coords2, sidelength))
    ref2 = coords2 * (2.0 / sidelength)
    assert out2.shape == coords2.shape and out2.dtype == coords2.dtype
    assert jnp.allclose(out2, ref2, rtol=1e-6, atol=1e-6)

    print("KERNEL_OK")
</pallas_src>

<mosaic_0001>
module attributes {stable_mosaic.version = 11 : i64} {
  func.func @_warp_kernel(%arg0: i32, %arg1: memref<1xf32, #tpu.memory_space<smem>>, %arg2: memref<3x128xf32, #tpu.memory_space<vmem>>, %arg3: memref<3x128xf32, #tpu.memory_space<vmem>>) attributes {dimension_semantics = [#tpu.dimension_semantics<parallel>], iteration_bounds = array<i64: 1>, scalar_prefetch = 0 : i64, scratch_operands = 0 : i64, tpu.core_type = #tpu.core_type<tc>, window_params = [{transform_indices = @transform_0, window_bounds = array<i64: 1>}, {transform_indices = @transform_1, window_bounds = array<i64: 3, 128>}, {transform_indices = @transform_2, window_bounds = array<i64: 3, 128>}]} {
    %c0 = arith.constant 0 : index
    %0 = memref.load %arg1[%c0] : memref<1xf32, #tpu.memory_space<smem>>
    %c0_0 = arith.constant 0 : index
    %c0_1 = arith.constant 0 : index
    %1 = vector.load %arg2[%c0_0, %c0_1] : memref<3x128xf32, #tpu.memory_space<vmem>>, vector<3x128xf32>
    %2 = vector.broadcast %0 : f32 to vector<3x128xf32>
    %3 = arith.mulf %1, %2 : vector<3x128xf32>
    %c0_2 = arith.constant 0 : index
    %c0_3 = arith.constant 0 : index
    %4 = vector.load %arg3[%c0_2, %c0_3] : memref<3x128xf32, #tpu.memory_space<vmem>>, vector<3x128xf32>
    tpu.vector_store %arg3[%c0_2, %c0_3], %3 {strides = array<i32>} : memref<3x128xf32, #tpu.memory_space<vmem>>, vector<3x128xf32>,
    return
  }
  func.func @transform_0(%arg0: i32) -> i32 {
    %c0_i32 = arith.constant 0 : i32
    %c0_i32_0 = arith.constant 0 : i32
    return %c0_i32 : i32
  }
  func.func @transform_1(%arg0: i32) -> (i32, i32) {
    %c0_i32 = arith.constant 0 : i32
    %c0_i32_0 = arith.constant 0 : i32
    return %arg0, %c0_i32 : i32, i32
  }
  func.func @transform_2(%arg0: i32) -> (i32, i32) {
    %c0_i32 = arith.constant 0 : i32
    %c0_i32_0 = arith.constant 0 : i32
    return %arg0, %c0_i32 : i32, i32
  }
}

</mosaic_0001>

<bundles_post_ra>
// kernel: tpu_custom_call.1
= control target key start
LH: loop header
LB: loop body
LE: loop exit
PB: predicated region body
PF: predicated region fallthrough
CT: control target
= control target key end

     0   :  { %8 = vsyncpa [#allocation4], 0  ;;  %s129_s0 = inlined_call_operand.<no memory space> [shape: f32[1], index: 0, kind: input, shape index: {}]   ;;  %s130_s1 = inlined_call_operand.hbm [shape: f32[3,128], index: 1, kind: input, shape index: {}]   ;;  %s131_s2 = inlined_call_operand.hbm [shape: f32[3,128], index: 2, kind: output, shape index: {}]  }
   0x1   :  { %9 = vsyncpa [#allocation5], 0  ;;  %s17_s11 = sshll.u32 %s130_s1, 4  ;;  %s103_s12 = smov [#allocation3]   ;;  %s18_s11 = int_to_ptr.hbm [resolvable:$true] %s17_s11 }
   0x2   :  { %s19_s13 = sshll.u32 %s103_s12, 4  ;;  %s20_s13 = int_to_ptr.vmem [resolvable:$true] %s19_s13 }
   0x3   :  { %22 = dma.hbm_to_vmem [thread:$0]  %s18_s11, 64, %s20_s13, [#allocation4]  }
   0x4   :  { %99 = dma.done.wait [#allocation4], 64  }
   0x5   :  { %100 = vsyncadd [#allocation4], 4294967232  ;;  %v29_v0 = vstv %s129_s0  ;;  %s104_s16 = smov [#allocation6]   ;;  %s39_s20 = sshll.u32 %s131_s2, 4  ;;  %v28_v1 = vld [vmem:[#allocation3] sm:$0x7]  ;;  %s40_s20 = int_to_ptr.hbm [resolvable:$true] %s39_s20 }
   0x6   :  { %s37_s17 = sshll.u32 %s104_s16, 4  ;;  %v30_v2 = vmul.f32 %v29_v0, %v28_v1  ;;  %s38_s17 = int_to_ptr.vmem [resolvable:$true] %s37_s17 }
   0x8   :  { %31 = vst [vmem:[#allocation6] sm:$0x7] %v30_v2 }
   0x9   :  { %42 = dma.vmem_to_hbm [thread:$0]  %s38_s17, 64, %s40_s20, [#allocation5]  }
   0xa   :  { %101 = dma.done.wait [#allocation5], 64  }
   0xb   :  { %102 = vsyncadd [#allocation5], 4294967232 }
   0xc   :  { %47 = vsyncpa [#allocation4], 1 }
   0xd   :  { %48 = vsyncpa [#allocation5], 1 }

</bundles_post_ra>
